<compile_context>
chip_gen: v6e
topology: v6e:2x2x1
jax: 0.10.0
libtpu: 0.0.40
codegen_flags: <defaults>
</compile_context>

<pallas_src>
import functools

import jax
import jax.numpy as jnp
from jax.experimental import pallas as pl
from jax.experimental.pallas import tpu as pltpu


def _make_kernel(use_bf16_mxu):
    """Kernel over one (TM, C) batch tile; class dim is the real, unpadded C."""

    def kernel(x_ref, wt_ref, b_ref, lab_ref, z_ref, nll_ref):
        x = x_ref[...].astype(jnp.float32)                    # (TM, C)

        # log_softmax(x) over the class dim.
        m = jnp.max(x, axis=1, keepdims=True)
        lse = m + jnp.log(jnp.sum(jnp.exp(x - m), axis=1, keepdims=True))
        ln = x - lse

        # Linear layer: weight pre-transposed to (in, out) at prepare time.
        wt = wt_ref[...]
        if use_bf16_mxu:
            z = jnp.dot(ln.astype(jnp.bfloat16), wt.astype(jnp.bfloat16),
                        preferred_element_type=jnp.float32)
        else:
            z = jnp.dot(ln, wt, preferred_element_type=jnp.float32)
        z = z + b_ref[...]
        z_ref[...] = z.astype(z_ref.dtype)

        # Per-row cross-entropy NLL of the calibrated logits vs labels (f32).
        zmax = jnp.max(z, axis=1, keepdims=True)
        zlse = zmax + jnp.log(jnp.sum(jnp.exp(z - zmax), axis=1, keepdims=True))
        lane = jax.lax.broadcasted_iota(jnp.int32, z.shape, 1)
        onehot = (lane == lab_ref[...]).astype(jnp.float32)    # labels (TM, 1) int32
        z_lab = jnp.sum(z * onehot, axis=1, keepdims=True)
        nll_ref[...] = zlse - z_lab                            # (TM, 1) f32

    return kernel


def _pick_tile_rows(n, c, x_itemsize, z_itemsize, tile_rows):
    """Batch-tile rows: multiple of 8, >=2 tiles for modest N, VMEM-budgeted."""
    # >= 2 tiles when N is modest so v7x's second TensorCore gets work.
    tm = min(tile_rows, max(8, 8 * pl.cdiv(n, 16)))
    # Clamp by a ~24 MiB budget for the double-buffered x/z tiles (lane dim
    # rounded to 128 for VMEM accounting) -> fits v7x's 64 MiB physical VMEM.
    c_lanes = 128 * pl.cdiv(c, 128)
    bytes_per_row = c_lanes * (x_itemsize + z_itemsize)
    tm_budget = (24 * 1024 * 1024) // (2 * bytes_per_row)
    tm = min(tm, max(8, tm_budget))
    return max(8, (tm // 8) * 8)


def prepare_dirichlet_params(weight, bias):
    """One-time layout prep (hoisted out of the forward): W^T (in,out), (1,C) bias."""
    c = weight.shape[0]
    weight_t = jnp.asarray(weight, jnp.float32).T
    bias2d = jnp.asarray(bias, jnp.float32).reshape(1, c)
    return weight_t, bias2d


def init_dirichlet_params(num_class):
    """Matches Dirichlet_calibration._init_weight(): identity weight, zero bias."""
    return prepare_dirichlet_params(jnp.eye(num_class, dtype=jnp.float32),
                                    jnp.zeros((num_class,), jnp.float32))


@functools.partial(jax.jit, static_argnames=("tile_rows",))
def dirichlet_calibration(simple_vector, labels, weight_t, bias2d, *, tile_rows=2048):
    """Returns (calibrated_logits (N, C) in x.dtype, loss () f32, None)."""
    n, c = simple_vector.shape
    x_dtype = simple_vector.dtype
    x_bytes = jnp.dtype(x_dtype).itemsize

    tm = _pick_tile_rows(n, c, x_bytes, x_bytes, tile_rows)
    grid = (pl.cdiv(n, tm),)

    labels2d = labels.astype(jnp.int32).reshape(n, 1)

    # bf16 MXU inputs only once the C^2 matmul can bind (v6e/v7x large C);
    # memory-bound at small C, where the cast is pointless.
    use_bf16_mxu = c >= 512

    cost = pl.CostEstimate(
        flops=2 * n * c * c,
        transcendentals=2 * n * c + 2 * n,
        bytes_accessed=n * c * 2 * x_bytes + c * c * 4 + n * 8,
    )

    z, nll = pl.pallas_call(
        _make_kernel(use_bf16_mxu),
        out_shape=(
            jax.ShapeDtypeStruct((n, c), x_dtype),        # calibrated logits
            jax.ShapeDtypeStruct((n, 1), jnp.float32),    # per-row NLL
        ),
        grid=grid,
        in_specs=[
            pl.BlockSpec((tm, c), lambda i: (i, 0)),      # x tile (real C, no lane pad)
            # NOTE: at large C, W^T / bias could be single-buffered via
            # pipeline_mode=pl.Buffered(1) to halve their VMEM footprint;
            # left at the default here since C is small for this module.
            pl.BlockSpec((c, c), lambda i: (0, 0)),       # W^T, resident across tiles
            pl.BlockSpec((1, c), lambda i: (0, 0)),       # bias, resident
            pl.BlockSpec((tm, 1), lambda i: (i, 0)),      # labels tile
        ],
        out_specs=(
            pl.BlockSpec((tm, c), lambda i: (i, 0)),      # z tile
            pl.BlockSpec((tm, 1), lambda i: (i, 0)),      # per-row NLL tile
        ),
        compiler_params=pltpu.CompilerParams(
            dimension_semantics=("parallel",),            # tiles are independent
            vmem_limit_bytes=48 * 1024 * 1024,            # tiles budgeted to ~24 MiB;
        ),                                                # fits v7x 64 MiB physical
        cost_estimate=cost,
    )(simple_vector, weight_t, bias2d, labels2d)

    # CrossEntropyLoss(reduction="mean") over the real batch.  Pallas drops the
    # out-of-bounds writes of partial boundary tiles, so nll is exactly (N, 1).
    loss = jnp.mean(nll[:, 0])
    return z, loss, None


def _reference(simple_vector, labels, weight, bias):
    x = simple_vector.astype(jnp.float32)
    ln = jax.nn.log_softmax(x, axis=1)
    z = ln @ weight.T + bias
    logp = jax.nn.log_softmax(z, axis=1)
    nll = -jnp.take_along_axis(logp, labels[:, None].astype(jnp.int32), axis=1)
    return z, jnp.mean(nll)


def _check(n, c, key, *, tile_rows=2048):
    kx, kl, kw, kb = jax.random.split(key, 4)
    x = jax.random.normal(kx, (n, c), dtype=jnp.float32) * 3.0
    labels = jax.random.randint(kl, (n,), 0, c, dtype=jnp.int32)
    # _init_weight(): identity weight, zero bias; perturbed slightly so the
    # linear layer is non-trivial for the correctness check.
    weight = jnp.eye(c, dtype=jnp.float32) + 0.01 * jax.random.normal(kw, (c, c))
    bias = 0.01 * jax.random.normal(kb, (c,), dtype=jnp.float32)

    weight_t, bias2d = prepare_dirichlet_params(weight, bias)
    z, loss, softmaxed = dirichlet_calibration(x, labels, weight_t, bias2d,
                                               tile_rows=tile_rows)
    jax.block_until_ready((z, loss))

    z_ref, loss_ref = _reference(x, labels, weight, bias)
    assert z.shape == (n, c) and z.dtype == x.dtype
    assert jnp.allclose(z, z_ref, atol=1e-4, rtol=1e-4), "calibrated logits mismatch"
    assert jnp.allclose(loss, loss_ref, atol=1e-4, rtol=1e-4), "loss mismatch"
    assert softmaxed is None


if __name__ == "__main__":
    key = jax.random.PRNGKey(0)
    k1, k2, k3, k4 = jax.random.split(key, 4)

    # Toy module config (NUM_CLASS=10), single tile.
    _check(8, 10, k1)
    # Multi-tile grid (>= 2 tiles, exercises the "parallel" sharding path).
    _check(40, 10, k2, tile_rows=8)
    # Batch not a multiple of the tile (exercises boundary-block clipping).
    _check(13, 10, k3, tile_rows=8)

    # bf16 I/O smoke test: z comes back in bf16, loss stays f32 and finite.
    x16 = (jax.random.normal(k4, (32, 10), dtype=jnp.float32) * 3.0).astype(jnp.bfloat16)
    lab16 = jax.random.randint(k4, (32,), 0, 10, dtype=jnp.int32)
    wt0, b0 = init_dirichlet_params(10)
    z16, loss16, _ = dirichlet_calibration(x16, lab16, wt0, b0, tile_rows=16)
    jax.block_until_ready((z16, loss16))
    assert z16.dtype == jnp.bfloat16 and z16.shape == (32, 10)
    assert bool(jnp.isfinite(loss16))

    print("KERNEL_OK")
</pallas_src>

<mosaic_0001>
module attributes {stable_mosaic.version = 11 : i64} {
  func.func @kernel(%arg0: i32, %arg1: memref<8x10xf32, #tpu.memory_space<vmem>>, %arg2: memref<10x10xf32, #tpu.memory_space<vmem>>, %arg3: memref<1x10xf32, #tpu.memory_space<vmem>>, %arg4: memref<8x1xi32, #tpu.memory_space<vmem>>, %arg5: memref<8x10xf32, #tpu.memory_space<vmem>>, %arg6: memref<8x1xf32, #tpu.memory_space<vmem>>) attributes {dimension_semantics = [#tpu.dimension_semantics<parallel>], iteration_bounds = array<i64: 1>, scalar_prefetch = 0 : i64, scratch_operands = 0 : i64, tpu.core_type = #tpu.core_type<tc>, window_params = [{transform_indices = @transform_0, window_bounds = array<i64: 8, 10>}, {pipeline_mode = #tpu.pipeline_mode<synchronous>, transform_indices = @transform_1, window_bounds = array<i64: 10, 10>}, {pipeline_mode = #tpu.pipeline_mode<synchronous>, transform_indices = @transform_2, window_bounds = array<i64: 1, 10>}, {transform_indices = @transform_3, window_bounds = array<i64: 8, 1>}, {transform_indices = @transform_4, window_bounds = array<i64: 8, 10>}, {transform_indices = @transform_5, window_bounds = array<i64: 8, 1>}]} {
    %c0 = arith.constant 0 : index
    %c0_0 = arith.constant 0 : index
    %0 = vector.load %arg1[%c0, %c0_0] : memref<8x10xf32, #tpu.memory_space<vmem>>, vector<8x10xf32>
    %cst = arith.constant dense<0xFF800000> : vector<8xf32>
    %1 = vector.multi_reduction <maximumf>, %0, %cst [1] : vector<8x10xf32> to vector<8xf32>
    %2 = vector.shape_cast %1 : vector<8xf32> to vector<8x1xf32>
    %3 = vector.broadcast %2 : vector<8x1xf32> to vector<8x10xf32>
    %4 = arith.subf %0, %3 : vector<8x10xf32>
    %5 = math.exp %4 : vector<8x10xf32>
    %cst_1 = arith.constant dense<0.000000e+00> : vector<8xf32>
    %6 = vector.multi_reduction <add>, %5, %cst_1 [1] : vector<8x10xf32> to vector<8xf32>
    %7 = vector.shape_cast %6 : vector<8xf32> to vector<8x1xf32>
    %8 = math.log %7 : vector<8x1xf32>
    %9 = arith.addf %2, %8 : vector<8x1xf32>
    %10 = vector.broadcast %9 : vector<8x1xf32> to vector<8x10xf32>
    %11 = arith.subf %0, %10 : vector<8x10xf32>
    %c0_2 = arith.constant 0 : index
    %c0_3 = arith.constant 0 : index
    %12 = vector.load %arg2[%c0_2, %c0_3] : memref<10x10xf32, #tpu.memory_space<vmem>>, vector<10x10xf32>
    %cst_4 = arith.constant dense<0.000000e+00> : vector<8x10xf32>
    %13 = tpu.matmul %11, %12, %cst_4 {dimension_numbers = #tpu.dot_dimension_numbers<[1], [0], [0], [1], [0, 0, 1, 1], [], []>} : vector<8x10xf32>, vector<10x10xf32>, vector<8x10xf32> -> vector<8x10xf32>
    %c0_5 = arith.constant 0 : index
    %c0_6 = arith.constant 0 : index
    %14 = vector.load %arg3[%c0_5, %c0_6] : memref<1x10xf32, #tpu.memory_space<vmem>>, vector<1x10xf32>
    %15 = vector.broadcast %14 : vector<1x10xf32> to vector<8x10xf32>
    %16 = arith.addf %13, %15 : vector<8x10xf32>
    %c0_7 = arith.constant 0 : index
    %c0_8 = arith.constant 0 : index
    %17 = vector.load %arg5[%c0_7, %c0_8] : memref<8x10xf32, #tpu.memory_space<vmem>>, vector<8x10xf32>
    tpu.vector_store %arg5[%c0_7, %c0_8], %16 {strides = array<i32>} : memref<8x10xf32, #tpu.memory_space<vmem>>, vector<8x10xf32>,
    %cst_9 = arith.constant dense<0xFF800000> : vector<8xf32>
    %18 = vector.multi_reduction <maximumf>, %16, %cst_9 [1] : vector<8x10xf32> to vector<8xf32>
    %19 = vector.shape_cast %18 : vector<8xf32> to vector<8x1xf32>
    %20 = vector.broadcast %19 : vector<8x1xf32> to vector<8x10xf32>
    %21 = arith.subf %16, %20 : vector<8x10xf32>
    %22 = math.exp %21 : vector<8x10xf32>
    %cst_10 = arith.constant dense<0.000000e+00> : vector<8xf32>
    %23 = vector.multi_reduction <add>, %22, %cst_10 [1] : vector<8x10xf32> to vector<8xf32>
    %24 = vector.shape_cast %23 : vector<8xf32> to vector<8x1xf32>
    %25 = math.log %24 : vector<8x1xf32>
    %26 = arith.addf %19, %25 : vector<8x1xf32>
    %27 = tpu.iota {dimensions = array<i32: 1>} : vector<8x10xi32>
    %c0_11 = arith.constant 0 : index
    %c0_12 = arith.constant 0 : index
    %28 = vector.load %arg4[%c0_11, %c0_12] : memref<8x1xi32, #tpu.memory_space<vmem>>, vector<8x1xi32>
    %29 = vector.broadcast %28 : vector<8x1xi32> to vector<8x10xi32>
    %30 = arith.cmpi eq, %27, %29 : vector<8x10xi32>
    %31 = arith.extui %30 : vector<8x10xi1> to vector<8x10xi32>
    %32 = arith.sitofp %31 : vector<8x10xi32> to vector<8x10xf32>
    %33 = arith.mulf %16, %32 : vector<8x10xf32>
    %cst_13 = arith.constant dense<0.000000e+00> : vector<8xf32>
    %34 = vector.multi_reduction <add>, %33, %cst_13 [1] : vector<8x10xf32> to vector<8xf32>
    %35 = vector.shape_cast %34 : vector<8xf32> to vector<8x1xf32>
    %36 = arith.subf %26, %35 : vector<8x1xf32>
    %c0_14 = arith.constant 0 : index
    %c0_15 = arith.constant 0 : index
    %37 = vector.load %arg6[%c0_14, %c0_15] : memref<8x1xf32, #tpu.memory_space<vmem>>, vector<8x1xf32>
    tpu.vector_store %arg6[%c0_14, %c0_15], %36 {strides = array<i32>} : memref<8x1xf32, #tpu.memory_space<vmem>>, vector<8x1xf32>,
    return
  }
  func.func @transform_0(%arg0: i32) -> (i32, i32) {
    %c0_i32 = arith.constant 0 : i32
    %c0_i32_0 = arith.constant 0 : i32
    return %arg0, %c0_i32 : i32, i32
  }
  func.func @transform_1(%arg0: i32) -> (i32, i32) {
    %c0_i32 = arith.constant 0 : i32
    %c0_i32_0 = arith.constant 0 : i32
    %c0_i32_1 = arith.constant 0 : i32
    return %c0_i32, %c0_i32_0 : i32, i32
  }
  func.func @transform_2(%arg0: i32) -> (i32, i32) {
    %c0_i32 = arith.constant 0 : i32
    %c0_i32_0 = arith.constant 0 : i32
    %c0_i32_1 = arith.constant 0 : i32
    return %c0_i32, %c0_i32_0 : i32, i32
  }
  func.func @transform_3(%arg0: i32) -> (i32, i32) {
    %c0_i32 = arith.constant 0 : i32
    %c0_i32_0 = arith.constant 0 : i32
    return %arg0, %c0_i32 : i32, i32
  }
  func.func @transform_4(%arg0: i32) -> (i32, i32) {
    %c0_i32 = arith.constant 0 : i32
    %c0_i32_0 = arith.constant 0 : i32
    return %arg0, %c0_i32 : i32, i32
  }
  func.func @transform_5(%arg0: i32) -> (i32, i32) {
    %c0_i32 = arith.constant 0 : i32
    %c0_i32_0 = arith.constant 0 : i32
    return %arg0, %c0_i32 : i32, i32
  }
}

</mosaic_0001>

<bundles_post_ra>
// kernel: dirichlet_calibration.1
= control target key start
LH: loop header
LB: loop body
LE: loop exit
PB: predicated region body
PF: predicated region fallthrough
CT: control target
= control target key end

     0   :  { %11 = vsyncpa [#allocation3], 0  ;;  %s320_s0 = inlined_call_operand.vmem [shape: f32[8,10], index: 0, kind: input, shape index: {}]   ;;  %s321_s1 = inlined_call_operand.hbm [shape: f32[10,10], index: 1, kind: input, shape index: {}]   ;;  %s322_s2 = inlined_call_operand.vmem [shape: f32[1,10], index: 2, kind: input, shape index: {}]   ;;  %s323_s3 = inlined_call_operand.vmem [shape: s32[8,1], index: 3, kind: input, shape index: {}]   ;;  %s324_s4 = inlined_call_operand.hbm [shape: f32[8,10], index: 4, kind: output, shape index: {0}]   ;;  %s325_s5 = inlined_call_operand.vmem [shape: f32[8,1], index: 5, kind: output, shape index: {1}]  }
   0x1   :  { %12 = vsyncpa [#allocation4], 0  ;;  %s258_s18 = smov [#allocation2]  }
   0x2   :  { %s20_s19 = sshll.u32 %s258_s18, 4  ;;  %s21_s19 = int_to_ptr.vmem [resolvable:$true] %s20_s19 }
   0x3   :  { %s222_s20 = scalar_lea.vmem %s21_s19, 256  ;;  %p227_p1 = scmp.lt.s32.totalorder %s21_s19, %s21_s19 }
   0x4   :  { %p223_p0 = scmp.ne.s32.totalorder %s21_s19, %s222_s20  ;;  %p228_p2 = scmp.lt.s32.totalorder %s222_s20, %s222_s20 }
   0x6   :  { %p229_p3 = por %p228_p2, %p227_p1 }
   0x8   :  { %p230_p4 = pnand %p229_p3, %p223_p0 }
   0xa   :  { %233 = shalt.err (!%p230_p4)
}
   0xb   :  { %s259_s21 = smov 128   ;;  %s260_s22 = smov 8  }
   0xc   :  { %26 = dma.hbm_to_vmem [thread:$0]  %s321_s1, 256, %s21_s19, [#allocation3], %s259_s21, %s259_s21, %s260_s22  }
   0xd   :  { %254 = dma.done.wait [#allocation3], 256  }
   0xe   :  { %255 = vsyncadd [#allocation3], 4294967040  ;;  %vm35_vm0 = vcmask 80896   ;;  %v34_v0 = vld [vmem:[%s320_s0] sm:$0xff]  ;;  %v261_v7 = vmov 0.0   ;;  %vm61_vm1 = vcmask 1041408   ;;  %v148_v25 = vlaneseq }
   0xf   :  { %v36_v1 = vsel %vm35_vm0, %v34_v0, -inf  ;;  %190 = vmatprep.subr.mxu0 %v261_v7  ;;  %v50_v8 = vld [vmem:[#allocation2 + $0x8] sm:$0x3]  ;;  %v49_v9 = vld [vmem:[#allocation2] sm:$0xff]  ;;  %vm262_vm2 = vmmov 0   ;;  %v263_v15 = vmov 0  }
  0x10   :  { %37 = vmax.xlane.f32.xlu0 %v36_v1  ;;  %191 = vmatpush3.msk.msra.mxu0 %vm61_vm1, %v50_v8  ;;  %v183_v16 = vld [vmem:[%s322_s2] ss:$0 sm:$0xff]  ;;  %v149_v26 = vand.u32 127, %v148_v25  ;;  %s264_s2 = smov [#allocation5]  }
  0x11   :  { %194 = vmatprep.mubr.msk.f32.mxu0 %vm262_vm2, %v261_v7  ;;  %192 = vmatprep.subr.mxu0 %v261_v7  ;;  %v150_v21 = vld [vmem:[%s323_s3] sm:$0xff]  ;;  %s170_s3 = sshll.u32 %s264_s2, 4  ;;  %s171_s3 = int_to_ptr.vmem [resolvable:$true] %s170_s3 }
  0x12   :  { %193 = vmatpush3.msra.mxu0 %v49_v9  ;;  %204 = vset.pattern.permute.xlu1 %v263_v15  ;;  %s234_s29 = scalar_lea.vmem %s171_s3, 128  ;;  %p239_p6 = scmp.lt.s32.totalorder %s171_s3, %s171_s3 }
  0x13   :  { %205 = vset.pattern.permute.xlu0 %v263_v15  ;;  %p235_p5 = scmp.ne.s32.totalorder %s171_s3, %s234_s29  ;;  %p240_p7 = scmp.lt.s32.totalorder %s234_s29, %s234_s29 }
  0x15   :  { %p241_p8 = por %p240_p7, %p239_p6 }
  0x17   :  { %p242_p9 = pnand %p241_p8, %p235_p5 }
  0x99   :  { %v38_v2 = vpop.xlane.xlu0 %37 }
  0x9a   :  { %v39_v3 = vsub.f32 %v34_v0, %v38_v2 }
  0x9c   :  { %v40_v4 = vmul.f32 1.442695, %v39_v3 }
  0x9e   :  { %206 = vpow2.f32 %v40_v4 }
  0xab   :  { %v207_v5 = vpop.eup %206 }
  0xac   :  { %v42_v6 = vsel %vm35_vm0, %v207_v5, 0.0 }
  0xad   :  { %43 = vadd.xlane.f32.xlu0 %v42_v6 }
 0x136   :  { %v44_v10 = vpop.xlane.xlu0 %43 }
 0x137   :  { %208 = vlog2.f32 %v44_v10 }
 0x144   :  { %v209_v11 = vpop.eup %208 }
 0x145   :  { %v46_v12 = vmul.f32 0.6931472, %v209_v11 }
 0x147   :  { %v47_v13 = vadd.f32 %v46_v12, %v38_v2 }
 0x149   :  { %v48_v14 = vsub.f32 %v34_v0, %v47_v13 }
 0x14b   :  { %195 = vmatmul.mubr.msk.f32.vlgmr.msra.gmra.mxu0 %vm35_vm0, %v48_v14 }
 0x20b   :  { %v131_v17 = vpop.f32.mrf.mxu0 }
 0x20c   :  { %v132_v18 = vadd.f32 %v183_v16, %v131_v17 }
 0x20d   :  { %v196_v19 = vpop.f32.mrf.mxu0 }
 0x20e   :  { %135 = vst.msk [vmem:[#allocation5] sm:$0xff] %vm35_vm0, %v132_v18  ;;  %v136_v20 = vsel %vm35_vm0, %v132_v18, -inf }
 0x20f   :  { %137 = vmax.xlane.f32.xlu1 %v136_v20 }
 0x220   :  { %152 = vperm.xlu1 %204, %v150_v21  }
 0x298   :  { %v138_v22 = vpop.xlane.xlu1 %137 }
 0x299   :  { %v139_v23 = vsub.f32 %v132_v18, %v138_v22 }
 0x29b   :  { %v140_v24 = vmul.f32 1.442695, %v139_v23 }
 0x29c   :  { %v153_v27 = vpop.permute.xlu1 %152 }
 0x29d   :  { %210 = vpow2.f32 %v140_v24  ;;  %vm154_vm3 = vcmp.eq.s32.totalorder %v149_v26, %v153_v27 }
 0x29e   :  { %v186_v28 = vsel %vm154_vm3, 1.0, %v261_v7 }
 0x29f   :  { %v157_v31 = vmul.f32 %v186_v28, %v132_v18 }
 0x2a1   :  { %v158_v32 = vsel %vm35_vm0, %v157_v31, 0.0 }
 0x2aa   :  { %v211_v29 = vpop.eup %210 }
 0x2ab   :  { %v142_v30 = vsel %vm35_vm0, %v211_v29, 0.0 }
 0x2ac   :  { %143 = vadd.xlane.f32.xlu0 %v142_v30 }
 0x2b0   :  { %159 = vadd.xlane.f32.xlu0 %v158_v32 }
 0x2b1   :  { %245 = shalt.err (!%p242_p9)
}
 0x2b2   :  { %173 = dma.vmem_to_hbm [thread:$0]  %s171_s3, 128, %s324_s4, [#allocation4]   ;;  %vm162_vm4 = vcmask 7168  }
 0x335   :  { %v144_v33 = vpop.xlane.xlu0 %143 }
 0x336   :  { %212 = vlog2.f32 %v144_v33 }
 0x339   :  { %v160_v37 = vpop.xlane.xlu0 %159 }
 0x343   :  { %v213_v34 = vpop.eup %212 }
 0x344   :  { %v146_v35 = vmul.f32 0.6931472, %v213_v34 }
 0x346   :  { %v147_v36 = vadd.f32 %v146_v35, %v138_v22 }
 0x348   :  { %v161_v38 = vsub.f32 %v147_v36, %v160_v37 }
 0x34a   :  { %163 = vst.msk [vmem:[%s325_s5] sm:$0xff] %vm162_vm4, %v161_v38 }
 0x34b   :  { %256 = dma.done.wait [#allocation4], 128  }
 0x34c   :  { %257 = vsyncadd [#allocation4], 4294967168 }
 0x34d   :  { %181 = vsyncpa [#allocation3], 1 }
 0x34e   :  { %182 = vsyncpa [#allocation4], 1 }

</bundles_post_ra>
